<compile_context>
chip_gen: v6e
topology: v6e:2x2x1
jax: 0.10.0
libtpu: 0.0.40
codegen_flags: <defaults>
</compile_context>

<pallas_src>
import functools

import jax
import jax.numpy as jnp
from jax.experimental import pallas as pl
from jax.experimental.pallas import tpu as pltpu


def _round_up(x, m):
    return (x + m - 1) // m * m


def _vmem_bytes(t, h, c_pad, in_bytes):
    """Estimated VMEM working set for a row tile of t tokens."""
    f32 = 4
    return (
        2 * t * h * in_bytes            # x block, double-buffered
        + h * c_pad * in_bytes          # weight (grid-invariant: count once)
        + c_pad * f32                   # bias   (grid-invariant)
        + 2 * t * c_pad * f32           # logits output block buffers (lane-padded)
        + 4 * t * c_pad * f32           # CE temporaries (logits value, exp, selects)
        + 2 * t * 128 * 4               # packed target/mask block (lane-padded i32)
        + 2 * 8 * 128 * f32             # partial-sum slab
    )


def _inference_kernel(x_ref, w_ref, b_ref, tm_ref, logits_ref, part_ref,
                      *, n_classes):
    x = x_ref[...]                                    # (t, H)
    w = w_ref[...]                                    # (H, c_pad)
    b = b_ref[...].astype(jnp.float32)                # (1, c_pad); padded cols = -1e30

    # Projection (hot path -> MXU, f32 accumulate).  Padded weight columns are
    # zero, padded bias columns are -1e30, so padded logits underflow in exp.
    logits = jnp.dot(x, w, preferred_element_type=jnp.float32) + b   # (t, c_pad)

    # Unpadded HBM writeback: only the real C class columns are stored.
    logits_ref[...] = logits[:, :n_classes].astype(logits_ref.dtype)

    # Masked cross entropy (numerically stable log-sum-exp).
    m = jnp.max(logits, axis=-1, keepdims=True)                       # (t, 1)
    lse = jnp.log(jnp.sum(jnp.exp(logits - m), axis=-1,
                          keepdims=True)) + m                         # (t, 1)

    # Packed per-token stream: value == target if mask==1 else -1.
    tm = tm_ref[...]                                  # (t, 1) int32
    valid = tm >= 0                                   # (t, 1) bool
    msk = valid.astype(jnp.float32)                   # (t, 1)

    cls_iota = jax.lax.broadcasted_iota(jnp.int32, logits.shape, 1)
    onehot = cls_iota == tm                           # -1 never matches a class
    tgt_logit = jnp.sum(jnp.where(onehot, logits, 0.0), axis=-1,
                        keepdims=True)                # (t, 1)

    # NaN-safe masking: garbage edge rows (partial last tile) never reach the
    # sum because `valid` is False there (tm padded with -1).
    nll = jnp.where(valid, lse - tgt_logit, 0.0)      # (t, 1)

    nll_sum = jnp.sum(nll)
    cnt = jnp.sum(msk)
    sub = jax.lax.broadcasted_iota(jnp.int32, part_ref.shape, 1)
    part_ref[...] = jnp.where(sub == 0, nll_sum,
                              jnp.where(sub == 1, cnt, 0.0))


@functools.partial(jax.jit, static_argnames=("tn", "cast_to_bf16"))
def inference_layer_forward(vectors, mask, targets, w_t, bias, *,
                            tn=None, cast_to_bf16=False):
    """Pallas implementation of InferenceLayer.forward with use_crf=False.

    vectors: [B, S, H] float
    mask:    [B, S]    int   (1 = keep)
    targets: [B, S]    int
    w_t:     [H, C]    float (transpose of nn.Linear weight)
    bias:    [C]       float
    returns: (loss scalar float32, logits [B, S, C])
    """
    B, S, H = vectors.shape
    C = w_t.shape[1]
    N = B * S
    out_dtype = vectors.dtype

    # Lane-dense class dimension for the resident weight / MXU.
    # TODO(synk): on v6e/v7x a 256-multiple pad would fill the 256-wide MXU;
    # irrelevant while the kernel is HBM-bound.
    c_pad = _round_up(C, 128)

    # ---- generation-aware VMEM budget -------------------------------------
    try:
        vmem_cap = int(pltpu.get_tpu_info().vmem_capacity_bytes)
    except Exception:
        vmem_cap = 64 * 1024 * 1024            # conservative (v7x-sized) default
    if vmem_cap >= 128 * 1024 * 1024:          # v5e / v6e: 128 MiB VMEM
        budget = 96 * 1024 * 1024
        vmem_limit = 112 * 1024 * 1024
    else:                                      # v7x: 64 MiB VMEM per TensorCore
        budget = 40 * 1024 * 1024
        vmem_limit = 52 * 1024 * 1024

    in_bytes = 2 if cast_to_bf16 else jnp.dtype(vectors.dtype).itemsize

    # ---- row tile: as large as possible (<= 8192), VMEM-budgeted ----------
    cap = 8192 if tn is None else int(tn)
    t = max(8, min(_round_up(N, 8), _round_up(cap, 8)))
    while t > 8 and _vmem_bytes(t, H, c_pad, in_bytes) > budget:
        t = max(8, _round_up(t // 2, 8))
    num_tiles = pl.cdiv(N, t)
    n_pad = num_tiles * t

    # TODO(synk): if H * c_pad alone approaches the VMEM budget, tile the class
    # dimension with an online log-sum-exp carry instead of a resident weight.

    # ---- inputs (x is NOT padded; only the tiny side stream is) -----------
    x = vectors.reshape(N, H)
    wp = w_t
    if cast_to_bf16:
        x = x.astype(jnp.bfloat16)
        wp = wp.astype(jnp.bfloat16)

    tgt = targets.reshape(N).astype(jnp.int32)
    msk = mask.reshape(N).astype(jnp.int32)
    tm = jnp.where(msk == 1, tgt, jnp.int32(-1))      # -1 == masked out
    if n_pad != N:
        tm = jnp.pad(tm, (0, n_pad - N), constant_values=-1)
    tm = tm.reshape(n_pad, 1)

    bp = bias.reshape(1, C).astype(jnp.float32)
    if c_pad != C:
        wp = jnp.pad(wp, ((0, 0), (0, c_pad - C)))
        bp = jnp.pad(bp, ((0, 0), (0, c_pad - C)), constant_values=-1e30)

    cost = pl.CostEstimate(
        flops=int(2 * N * H * c_pad),
        transcendentals=int(N * (c_pad + 1)),
        bytes_accessed=int(N * H * in_bytes + H * c_pad * in_bytes
                           + c_pad * 4 + n_pad * 4
                           + N * C * jnp.dtype(out_dtype).itemsize
                           + num_tiles * 8 * 128 * 4),
    )

    kernel = functools.partial(_inference_kernel, n_classes=C)

    # TODO(synk): on v7x (2 TensorCores) gate dimension_semantics to
    # pltpu.CORE_PARALLEL on the row axis so both cores split the row tiles.
    logits_flat, partials = pl.pallas_call(
        kernel,
        out_shape=(
            jax.ShapeDtypeStruct((N, C), out_dtype),
            jax.ShapeDtypeStruct((num_tiles, 8, 128), jnp.float32),
        ),
        grid_spec=pltpu.PrefetchScalarGridSpec(
            num_scalar_prefetch=0,
            grid=(num_tiles,),
            in_specs=[
                pl.BlockSpec((t, H), lambda i: (i, 0)),          # x block
                pl.BlockSpec((H, c_pad), lambda i: (0, 0)),      # weight (resident)
                pl.BlockSpec((1, c_pad), lambda i: (0, 0)),      # bias
                pl.BlockSpec((t, 1), lambda i: (i, 0)),          # packed target/mask
            ],
            out_specs=[
                pl.BlockSpec((t, C), lambda i: (i, 0)),          # logits (unpadded C)
                pl.BlockSpec((1, 8, 128), lambda i: (i, 0, 0)),  # partial sums
            ],
        ),
        compiler_params=pltpu.CompilerParams(
            dimension_semantics=("parallel",),
            vmem_limit_bytes=int(vmem_limit)),
        cost_estimate=cost,
    )(x, wp, bp, tm)

    logits = logits_flat.reshape(B, S, C)
    nll_total = jnp.sum(partials[:, 0, 0])
    cnt_total = jnp.sum(partials[:, 1, 0])
    # Matches reference semantics (NaN if every token is masked).
    loss = nll_total / cnt_total
    return loss, logits


def _reference(vectors, mask, targets, w_t, bias):
    logits = jnp.einsum("bsh,hc->bsc", vectors, w_t) + bias
    N = vectors.shape[0] * vectors.shape[1]
    C = w_t.shape[1]
    lf = logits.reshape(N, C)
    tf = targets.reshape(N)
    mf = (mask.reshape(N) == 1).astype(jnp.float32)
    lse = jax.nn.logsumexp(lf, axis=-1)
    nll = lse - jnp.take_along_axis(lf, tf[:, None], axis=-1)[:, 0]
    loss = jnp.sum(nll * mf) / jnp.sum(mf)
    return loss, logits


if __name__ == "__main__":
    # Small shapes consistent with the module: batch=2, seq=8, hidden=32, classes=8.
    B, S, H, C = 2, 8, 32, 8
    key = jax.random.PRNGKey(0)
    k1, k2, k3, k4, k5 = jax.random.split(key, 5)

    vectors = jax.random.normal(k1, (B, S, H), dtype=jnp.float32)
    targets = jax.random.randint(k2, (B, S), 0, C, dtype=jnp.int32)
    mask = (jax.random.uniform(k3, (B, S)) > 0.3).astype(jnp.int32)
    mask = mask.at[0, 0].set(1)   # ensure at least one unmasked token

    # Deterministic synthetic parameters (nn.Linear shapes [C, H] / [C]).
    w = jax.random.normal(k4, (C, H), dtype=jnp.float32) * (1.0 / jnp.sqrt(H))
    bias = jax.random.normal(k5, (C,), dtype=jnp.float32) * 0.01
    w_t = w.T  # [H, C] layout for the kernel

    loss, logits = inference_layer_forward(vectors, mask, targets, w_t, bias)
    jax.block_until_ready((loss, logits))

    ref_loss, ref_logits = _reference(vectors, mask, targets, w_t, bias)
    assert jnp.allclose(logits, ref_logits, atol=1e-4, rtol=1e-4)
    assert jnp.allclose(loss, ref_loss, atol=1e-5, rtol=1e-5)

    print("KERNEL_OK")
</pallas_src>

<mosaic_0001>
module attributes {stable_mosaic.version = 11 : i64} {
  func.func @_inference_kernel(%arg0: i32, %arg1: memref<16x32xf32, #tpu.memory_space<vmem>>, %arg2: memref<32x128xf32, #tpu.memory_space<vmem>>, %arg3: memref<1x128xf32, #tpu.memory_space<vmem>>, %arg4: memref<16x1xi32, #tpu.memory_space<vmem>>, %arg5: memref<16x8xf32, #tpu.memory_space<vmem>>, %arg6: memref<1x8x128xf32, #tpu.memory_space<vmem>>) attributes {dimension_semantics = [#tpu.dimension_semantics<parallel>], iteration_bounds = array<i64: 1>, scalar_prefetch = 0 : i64, scratch_operands = 0 : i64, tpu.core_type = #tpu.core_type<tc>, window_params = [{transform_indices = @transform_0, window_bounds = array<i64: 16, 32>}, {pipeline_mode = #tpu.pipeline_mode<synchronous>, transform_indices = @transform_1, window_bounds = array<i64: 32, 128>}, {pipeline_mode = #tpu.pipeline_mode<synchronous>, transform_indices = @transform_2, window_bounds = array<i64: 1, 128>}, {transform_indices = @transform_3, window_bounds = array<i64: 16, 1>}, {transform_indices = @transform_4, window_bounds = array<i64: 16, 8>}, {transform_indices = @transform_5, window_bounds = array<i64: 1, 8, 128>}]} {
    %c0 = arith.constant 0 : index
    %c0_0 = arith.constant 0 : index
    %0 = vector.load %arg1[%c0, %c0_0] : memref<16x32xf32, #tpu.memory_space<vmem>>, vector<16x32xf32>
    %c0_1 = arith.constant 0 : index
    %c0_2 = arith.constant 0 : index
    %1 = vector.load %arg2[%c0_1, %c0_2] : memref<32x128xf32, #tpu.memory_space<vmem>>, vector<32x128xf32>
    %c0_3 = arith.constant 0 : index
    %c0_4 = arith.constant 0 : index
    %2 = vector.load %arg3[%c0_3, %c0_4] : memref<1x128xf32, #tpu.memory_space<vmem>>, vector<1x128xf32>
    %cst = arith.constant dense<0.000000e+00> : vector<16x128xf32>
    %3 = tpu.matmul %0, %1, %cst {dimension_numbers = #tpu.dot_dimension_numbers<[1], [0], [0], [1], [0, 0, 1, 1], [], []>} : vector<16x32xf32>, vector<32x128xf32>, vector<16x128xf32> -> vector<16x128xf32>
    %4 = vector.broadcast %2 : vector<1x128xf32> to vector<16x128xf32>
    %5 = arith.addf %3, %4 : vector<16x128xf32>
    %6 = vector.extract_strided_slice %5 {offsets = [0, 0], sizes = [16, 8], strides = [1, 1]} : vector<16x128xf32> to vector<16x8xf32>
    %c0_5 = arith.constant 0 : index
    %c0_6 = arith.constant 0 : index
    %7 = vector.load %arg5[%c0_5, %c0_6] : memref<16x8xf32, #tpu.memory_space<vmem>>, vector<16x8xf32>
    tpu.vector_store %arg5[%c0_5, %c0_6], %6 {strides = array<i32>} : memref<16x8xf32, #tpu.memory_space<vmem>>, vector<16x8xf32>,
    %cst_7 = arith.constant dense<0xFF800000> : vector<16xf32>
    %8 = vector.multi_reduction <maximumf>, %5, %cst_7 [1] : vector<16x128xf32> to vector<16xf32>
    %9 = vector.shape_cast %8 : vector<16xf32> to vector<16x1xf32>
    %10 = vector.broadcast %9 : vector<16x1xf32> to vector<16x128xf32>
    %11 = arith.subf %5, %10 : vector<16x128xf32>
    %12 = math.exp %11 : vector<16x128xf32>
    %cst_8 = arith.constant dense<0.000000e+00> : vector<16xf32>
    %13 = vector.multi_reduction <add>, %12, %cst_8 [1] : vector<16x128xf32> to vector<16xf32>
    %14 = vector.shape_cast %13 : vector<16xf32> to vector<16x1xf32>
    %15 = math.log %14 : vector<16x1xf32>
    %16 = arith.addf %15, %9 : vector<16x1xf32>
    %c0_9 = arith.constant 0 : index
    %c0_10 = arith.constant 0 : index
    %17 = vector.load %arg4[%c0_9, %c0_10] : memref<16x1xi32, #tpu.memory_space<vmem>>, vector<16x1xi32>
    %c0_i32 = arith.constant 0 : i32
    %18 = vector.broadcast %c0_i32 : i32 to vector<16x1xi32>
    %19 = arith.cmpi sge, %17, %18 : vector<16x1xi32>
    %20 = arith.extui %19 : vector<16x1xi1> to vector<16x1xi32>
    %21 = arith.sitofp %20 : vector<16x1xi32> to vector<16x1xf32>
    %22 = tpu.iota {dimensions = array<i32: 1>} : vector<16x128xi32>
    %23 = vector.broadcast %17 : vector<16x1xi32> to vector<16x128xi32>
    %24 = arith.cmpi eq, %22, %23 : vector<16x128xi32>
    %cst_11 = arith.constant 0.000000e+00 : f32
    %25 = vector.broadcast %cst_11 : f32 to vector<16x128xf32>
    %26 = arith.select %24, %5, %25 : vector<16x128xi1>, vector<16x128xf32>
    %cst_12 = arith.constant dense<0.000000e+00> : vector<16xf32>
    %27 = vector.multi_reduction <add>, %26, %cst_12 [1] : vector<16x128xf32> to vector<16xf32>
    %28 = vector.shape_cast %27 : vector<16xf32> to vector<16x1xf32>
    %29 = arith.subf %16, %28 : vector<16x1xf32>
    %cst_13 = arith.constant 0.000000e+00 : f32
    %30 = vector.broadcast %cst_13 : f32 to vector<16x1xf32>
    %31 = arith.select %19, %29, %30 : vector<16x1xi1>, vector<16x1xf32>
    %32 = vector.shape_cast %31 : vector<16x1xf32> to vector<1x16x1xf32>
    %cst_14 = arith.constant dense<0.000000e+00> : vector<1xf32>
    %33 = vector.multi_reduction <add>, %32, %cst_14 [1, 2] : vector<1x16x1xf32> to vector<1xf32>
    %34 = vector.shape_cast %33 : vector<1xf32> to vector<1x1x1xf32>
    %35 = vector.extract %34[0, 0, 0] : f32 from vector<1x1x1xf32>
    %36 = vector.shape_cast %21 : vector<16x1xf32> to vector<1x16x1xf32>
    %cst_15 = arith.constant dense<0.000000e+00> : vector<1xf32>
    %37 = vector.multi_reduction <add>, %36, %cst_15 [1, 2] : vector<1x16x1xf32> to vector<1xf32>
    %38 = vector.shape_cast %37 : vector<1xf32> to vector<1x1x1xf32>
    %39 = vector.extract %38[0, 0, 0] : f32 from vector<1x1x1xf32>
    %40 = tpu.iota {dimensions = array<i32: 1>} : vector<1x8x128xi32>
    %c0_i32_16 = arith.constant 0 : i32
    %41 = vector.broadcast %c0_i32_16 : i32 to vector<1x8x128xi32>
    %42 = arith.cmpi eq, %40, %41 : vector<1x8x128xi32>
    %c1_i32 = arith.constant 1 : i32
    %43 = vector.broadcast %c1_i32 : i32 to vector<1x8x128xi32>
    %44 = arith.cmpi eq, %40, %43 : vector<1x8x128xi32>
    %cst_17 = arith.constant 0.000000e+00 : f32
    %45 = vector.broadcast %39 : f32 to vector<1x8x128xf32>
    %46 = vector.broadcast %cst_17 : f32 to vector<1x8x128xf32>
    %47 = arith.select %44, %45, %46 : vector<1x8x128xi1>, vector<1x8x128xf32>
    %48 = vector.broadcast %35 : f32 to vector<1x8x128xf32>
    %49 = arith.select %42, %48, %47 : vector<1x8x128xi1>, vector<1x8x128xf32>
    %c0_18 = arith.constant 0 : index
    %c0_19 = arith.constant 0 : index
    %c0_20 = arith.constant 0 : index
    %50 = vector.load %arg6[%c0_18, %c0_19, %c0_20] : memref<1x8x128xf32, #tpu.memory_space<vmem>>, vector<1x8x128xf32>
    tpu.vector_store %arg6[%c0_18, %c0_19, %c0_20], %49 {strides = array<i32>} : memref<1x8x128xf32, #tpu.memory_space<vmem>>, vector<1x8x128xf32>,
    return
  }
  func.func @transform_0(%arg0: i32) -> (i32, i32) {
    %c0_i32 = arith.constant 0 : i32
    %c0_i32_0 = arith.constant 0 : i32
    return %arg0, %c0_i32 : i32, i32
  }
  func.func @transform_1(%arg0: i32) -> (i32, i32) {
    %c0_i32 = arith.constant 0 : i32
    %c0_i32_0 = arith.constant 0 : i32
    %c0_i32_1 = arith.constant 0 : i32
    return %c0_i32, %c0_i32_0 : i32, i32
  }
  func.func @transform_2(%arg0: i32) -> (i32, i32) {
    %c0_i32 = arith.constant 0 : i32
    %c0_i32_0 = arith.constant 0 : i32
    %c0_i32_1 = arith.constant 0 : i32
    return %c0_i32, %c0_i32_0 : i32, i32
  }
  func.func @transform_3(%arg0: i32) -> (i32, i32) {
    %c0_i32 = arith.constant 0 : i32
    %c0_i32_0 = arith.constant 0 : i32
    return %arg0, %c0_i32 : i32, i32
  }
  func.func @transform_4(%arg0: i32) -> (i32, i32) {
    %c0_i32 = arith.constant 0 : i32
    %c0_i32_0 = arith.constant 0 : i32
    return %arg0, %c0_i32 : i32, i32
  }
  func.func @transform_5(%arg0: i32) -> (i32, i32, i32) {
    %c0_i32 = arith.constant 0 : i32
    %c0_i32_0 = arith.constant 0 : i32
    %c0_i32_1 = arith.constant 0 : i32
    return %arg0, %c0_i32, %c0_i32_0 : i32, i32, i32
  }
}

</mosaic_0001>

<bundles_post_ra>
// kernel: inference_layer_forward.1
= control target key start
LH: loop header
LB: loop body
LE: loop exit
PB: predicated region body
PF: predicated region fallthrough
CT: control target
= control target key end

     0   :  { %vm33_vm0 = vcmask 261120   ;;  %v283_v3 = vmov 0   ;;  %s375_s0 = inlined_call_operand.vmem [shape: f32[16,32], index: 0, kind: input, shape index: {}]   ;;  %s376_s1 = inlined_call_operand.vmem [shape: f32[32,128], index: 1, kind: input, shape index: {}]   ;;  %s377_s2 = inlined_call_operand.vmem [shape: f32[1,128], index: 2, kind: input, shape index: {}]   ;;  %s378_s3 = inlined_call_operand.vmem [shape: s32[16,1], index: 3, kind: input, shape index: {}]   ;;  %s379_s4 = inlined_call_operand.hbm [shape: f32[16,8], index: 4, kind: output, shape index: {0}]   ;;  %s380_s5 = inlined_call_operand.vmem [shape: f32[1,8,128], index: 5, kind: output, shape index: {1}]  }
   0x1   :  { %v25_v0 = vld [vmem:[%s376_s1 + $0x18] sm:$0xff]  ;;  %v24_v1 = vld [vmem:[%s376_s1 + $0x10] sm:$0xff]  ;;  %v20_v2 = vld [vmem:[%s375_s0] sm:$0xff]  ;;  %251 = vset.pattern.permute.xlu1 %v283_v3 }
   0x2   :  { %231 = vmatprep.subr.mxu0 %v25_v0  ;;  %v23_v4 = vld [vmem:[%s376_s1 + $0x8] sm:$0xff]  ;;  %239 = vmatprep.mubr.msk.f32.mxu0 %vm33_vm0, %v20_v2  ;;  %v334_v5 = vld [vmem:[%s378_s3] sm:$0xff] }
   0x3   :  { %232 = vmatpush3.msra.mxu0 %v25_v0 }
   0x4   :  { %11 = vsyncpa [#allocation3], 0  ;;  %233 = vmatprep.subr.mxu0 %v24_v1  ;;  %149 = vperm.xlu1 %251, %v334_v5   ;;  %v22_v6 = vld [vmem:[%s376_s1] sm:$0xff]  ;;  %v343_v7 = vld [vmem:[%s378_s3 + $0x8] sm:$0xff]  ;;  %vm115_vm1 = vcmask 64512   ;;  %v146_v20 = vlaneseq  ;;  %vm140_vm4 = vcmp.ge.s32.totalorder %v334_v5, 0 }
   0x5   :  { %234 = vmatpush3.msra.mxu0 %v24_v1  ;;  %252 = vset.pattern.permute.xlu0 %v283_v3  ;;  %v21_v8 = vld [vmem:[%s375_s0 + $0x8] sm:$0xff]  ;;  %v220_v9 = vld [vmem:[%s377_s2] ss:$0 sm:$0xff]  ;;  %v284_v28 = vmov 0.0   ;;  %vm141_vm5 = vcmp.ge.s32.totalorder %v343_v7, 0  ;;  %vm166_vm6 = vcmask 7168  }
   0x6   :  { %235 = vmatprep.subr.mxu0 %v23_v4  ;;  %v147_v22 = vand.u32 127, %v146_v20  ;;  %v223_v29 = vsel %vm140_vm4, 1.0, %v284_v28  ;;  %v224_v30 = vsel %vm141_vm5, 1.0, %v284_v28  ;;  %s285_s0 = smov [#allocation2]  }
   0x7   :  { %236 = vmatpush3.msra.mxu0 %v23_v4  ;;  %v179_v31 = vsel %vm166_vm6, %v223_v29, 0.0  ;;  %v180_v32 = vsel %vm166_vm6, %v224_v30, 0.0  ;;  %s205_s2 = sshll.u32 %s285_s0, 4  ;;  %s206_s2 = int_to_ptr.vmem [resolvable:$true] %s205_s2 }
   0x8   :  { %237 = vmatprep.subr.mxu0 %v22_v6  ;;  %152 = vperm.xlu1 %251, %v343_v7   ;;  %v181_v33 = vadd.f32 %v180_v32, %v179_v31  ;;  %s261_s3 = scalar_lea.vmem %s206_s2, 256  ;;  %p266_p1 = scmp.lt.s32.totalorder %s206_s2, %s206_s2 }
   0x9   :  { %238 = vmatpush3.msra.mxu0 %v22_v6  ;;  %p262_p0 = scmp.ne.s32.totalorder %s206_s2, %s261_s3  ;;  %p267_p2 = scmp.lt.s32.totalorder %s261_s3, %s261_s3 }
   0xa   :  { %240 = vmatmul.mubr.msk.f32.vlgmr.msra.gmra.mxu0 %vm33_vm0, %v21_v8 }
   0xb   :  { %p268_p3 = por %p267_p2, %p266_p1 }
   0xd   :  { %p269_p4 = pnand %p268_p3, %p262_p0 }
  0x7f   :  { %v150_v21 = vpop.permute.xlu1 %149 }
  0x80   :  { %vm154_vm2 = vcmp.eq.s32.totalorder %v147_v22, %v150_v21 }
  0x83   :  { %v153_v24 = vpop.permute.xlu1 %152 }
  0x84   :  { %vm155_vm3 = vcmp.eq.s32.totalorder %v147_v22, %v153_v24 }
  0xca   :  { %v241_v10 = vpop.f32.mrf.mxu0 }
  0xcb   :  { %v112_v11 = vadd.f32 %v241_v10, %v220_v9 }
  0xcc   :  { %v106_v12 = vpop.f32.mrf.mxu0 }
  0xcd   :  { %v107_v13 = vadd.f32 %v220_v9, %v106_v12  ;;  %117 = vst.msk [vmem:[#allocation2 + $0x8] sm:$0xff] %vm115_vm1, %v112_v11  ;;  %v157_v27 = vsel %vm155_vm3, %v112_v11, 0.0 }
  0xcf   :  { %118 = vmax.xlane.f32.xlu0 %v107_v13  ;;  %116 = vst.msk [vmem:[#allocation2] sm:$0xff] %vm115_vm1, %v107_v13  ;;  %v156_v26 = vsel %vm154_vm2, %v107_v13, 0.0 }
  0xd3   :  { %120 = vmax.xlane.f32.xlu0 %v112_v11 }
 0x158   :  { %v119_v14 = vpop.xlane.xlu0 %118 }
 0x159   :  { %v122_v15 = vsub.f32 %v107_v13, %v119_v14 }
 0x15b   :  { %v124_v16 = vmul.f32 1.442695, %v122_v15 }
 0x15c   :  { %v121_v17 = vpop.xlane.xlu0 %120 }
 0x15d   :  { %253 = vpow2.f32 %v124_v16  ;;  %v123_v18 = vsub.f32 %v112_v11, %v121_v17 }
 0x15f   :  { %v126_v19 = vmul.f32 1.442695, %v123_v18 }
 0x161   :  { %255 = vpow2.f32 %v126_v19 }
 0x16a   :  { %v254_v23 = vpop.eup %253 }
 0x16b   :  { %128 = vadd.xlane.f32.xlu0 %v254_v23 }
 0x16e   :  { %v256_v25 = vpop.eup %255 }
 0x16f   :  { %130 = vadd.xlane.f32.xlu1 %v256_v25  ;;  %158 = vadd.xlane.f32.xlu0 %v156_v26 }
 0x173   :  { %160 = vadd.xlane.f32.xlu0 %v157_v27 }
 0x1f4   :  { %v129_v34 = vpop.xlane.xlu0 %128 }
 0x1f5   :  { %257 = vlog2.f32 %v129_v34 }
 0x1f8   :  { %v131_v35 = vpop.xlane.xlu1 %130  ;;  %v159_v38 = vpop.xlane.xlu0 %158 }
 0x1f9   :  { %259 = vlog2.f32 %v131_v35 }
 0x1fc   :  { %v161_v44 = vpop.xlane.xlu0 %160 }
 0x202   :  { %v258_v36 = vpop.eup %257 }
 0x203   :  { %v133_v37 = vmul.f32 0.6931472, %v258_v36 }
 0x205   :  { %v136_v39 = vadd.f32 %v133_v37, %v119_v14 }
 0x206   :  { %v260_v40 = vpop.eup %259 }
 0x207   :  { %v135_v41 = vmul.f32 0.6931472, %v260_v40  ;;  %v162_v42 = vsub.f32 %v136_v39, %v159_v38 }
 0x209   :  { %v137_v43 = vadd.f32 %v135_v41, %v121_v17  ;;  %v164_v45 = vsel %vm140_vm4, %v162_v42, 0.0 }
 0x20a   :  { %v167_v48 = vsel %vm166_vm6, %v164_v45, 0.0 }
 0x20b   :  { %v163_v46 = vsub.f32 %v137_v43, %v161_v44 }
 0x20d   :  { %v165_v47 = vsel %vm141_vm5, %v163_v46, 0.0 }
 0x20e   :  { %v168_v49 = vsel %vm166_vm6, %v165_v47, 0.0 }
 0x20f   :  { %v169_v50 = vadd.f32 %v168_v49, %v167_v48 }
 0x211   :  { %170 = vadd.xlane.f32.xlu0 %v169_v50 }
 0x215   :  { %182 = vadd.xlane.f32.xlu0 %v181_v33 }
 0x216   :  { %272 = shalt.err (!%p269_p4)
}
 0x217   :  { %s286_s10 = smov 128   ;;  %s287_s11 = smov 8   ;;  %v192_v1 = vshrl.u32 %v146_v20, 7 }
 0x218   :  { %211 = dma.vmem_to_hbm [thread:$0]  %s206_s2, 256, %s379_s4, [#allocation3], %s286_s10, %s286_s10, %s287_s11  }
 0x219   :  { %vm194_vm7 = vcmp.eq.s32.totalorder %v192_v1, 1  ;;  %vm193_vm8 = vcmp.eq.s32.totalorder %v192_v1, 0 }
 0x29a   :  { %v171_v51 = vpop.xlane.xlu0 %170 }
 0x29b   :  { %v172_v52 = vrot.slane %v171_v51, 4 }
 0x29d   :  { %v173_v53 = vadd.f32 %v172_v52, %v171_v51 }
 0x29e   :  { %v183_v54 = vpop.xlane.xlu0 %182 }
 0x29f   :  { %v174_v55 = vrot.slane %v173_v53, 2  ;;  %v184_v56 = vrot.slane %v183_v54, 4 }
 0x2a1   :  { %v185_v57 = vadd.f32 %v184_v56, %v183_v54  ;;  %v175_v58 = vadd.f32 %v174_v55, %v173_v53 }
 0x2a3   :  { %v186_v59 = vrot.slane %v185_v57, 2  ;;  %v176_v60 = vrot.slane %v175_v58, 1 }
 0x2a5   :  { %v187_v61 = vadd.f32 %v186_v59, %v185_v57  ;;  %v177_v62 = vadd.f32 %v176_v60, %v175_v58 }
 0x2a7   :  { %242 = vpush %v177_v62  ;;  %v188_v63 = vrot.slane %v187_v61, 1 }
 0x2a9   :  { %v189_v0 = vadd.f32 %v188_v63, %v187_v61 }
 0x2ab   :  { %244 = vpush %v189_v0 }
 0x2d8   :  { %s243_s14 = spop %242 }
 0x2d9   :  { %v197_v3 = vstv %s243_s14 }
 0x2dc   :  { %s245_s4 = spop %244 }
 0x2dd   :  { %v195_v2 = vstv %s245_s4 }
 0x2de   :  { %v196_v4 = vsel %vm194_vm7, %v195_v2, 0.0 }
 0x2df   :  { %v198_v5 = vsel %vm193_vm8, %v197_v3, %v196_v4 }
 0x2e0   :  { %199 = vst [vmem:[%s380_s5] sm:$0xff] %v198_v5 }
 0x2e1   :  { %281 = dma.done.wait [#allocation3], 256  }
 0x2e2   :  { %282 = vsyncadd [#allocation3], 4294967040 }
 0x2e3   :  { %219 = vsyncpa [#allocation3], 1 }

</bundles_post_ra>
